<compile_context>
chip_gen: v5e
topology: v5e:2x2
jax: 0.10.0
libtpu: 0.0.40
codegen_flags: <defaults>
</compile_context>

<pallas_src>
import functools

import jax
import jax.numpy as jnp
from jax.experimental import pallas as pl
from jax.experimental.pallas import tpu as pltpu


_MAX_TILE_B = 512     # batch rows per block (multiple of 8)
_MAX_TILE_F = 4096    # features per block (multiple of 128 when F is tiled)


def _round_up(v, m):
    return ((v + m - 1) // m) * m


def _logreg_kernel(x_ref, w_ref, b_ref, o_ref, acc_ref, *,
                   tile_f, f_total, mask_features):
    # x_ref: (TILE_B, TILE_F) VMEM    w_ref: (1, TILE_F) VMEM
    # b_ref: (1, 1) SMEM              o_ref: (1, 1, TILE_B) VMEM
    # acc_ref: (1, TILE_B) f32 VMEM scratch, persists across the K axis.
    k = pl.program_id(1)

    @pl.when(k == 0)
    def _():
        acc_ref[...] = jnp.zeros_like(acc_ref)

    x = x_ref[...]
    if mask_features:
        # The final (partial) K tile over-reads along features: out-of-bounds
        # lanes of the VMEM block are undefined, so zero them before the dot
        # (zero-padded w lanes alone would not protect against NaN/Inf junk).
        lane = jax.lax.broadcasted_iota(jnp.int32, x.shape, 1)
        x = jnp.where(k * tile_f + lane < f_total, x, 0.0)

    # Contract the feature axis of w (1, TILE_F) against the feature axis of
    # x (TILE_B, TILE_F): partial logits land lane-dense as (1, TILE_B), so
    # no sublane->lane transpose and no masked column stores.
    acc_ref[...] += jax.lax.dot_general(
        w_ref[...], x,
        dimension_numbers=(((1,), (1,)), ((), ())),
        preferred_element_type=jnp.float32,
    )

    @pl.when(k == pl.num_programs(1) - 1)
    def _():
        z = acc_ref[...] + b_ref[0, 0]        # VPU bias add
        y = jax.nn.sigmoid(z)                 # EUP sigmoid
        o_ref[...] = y[None].astype(o_ref.dtype)


def logistic_regression_forward(x, weight, bias):
    """x: (B, F) f32, weight: (1, F) f32, bias: (1,) f32  ->  (B, 1) f32."""
    B, F = x.shape

    # --- batch tiling: never pad x; a partial last block is fine because ----
    # --- each output lane depends only on its own row. ----------------------
    if B <= 8:
        tile_b = B                               # block == full batch dim
    elif B <= 2 * _MAX_TILE_B:
        # Split into (at least) two blocks so both v7x TensorCores get work
        # from the "parallel" batch axis.
        tile_b = _round_up(pl.cdiv(B, 2), 8)
    else:
        tile_b = _MAX_TILE_B
    nb = pl.cdiv(B, tile_b)

    # --- feature tiling: single K step whenever F fits one block. -----------
    if F <= _MAX_TILE_F:
        tile_f, nk = F, 1
        mask_features = False
        w = weight
    else:
        tile_f = _MAX_TILE_F
        nk = pl.cdiv(F, tile_f)
        mask_features = (F % tile_f) != 0
        # Pad only the (tiny) weight row so its K blocks never over-read;
        # x itself is streamed untouched.
        w = (jnp.pad(weight, ((0, 0), (0, nk * tile_f - F)))
             if mask_features else weight)

    b2d = bias.reshape(1, 1)
    kernel = functools.partial(_logreg_kernel, tile_f=tile_f, f_total=F,
                               mask_features=mask_features)

    # Triple-buffer the x stream when the grid is long enough to benefit.
    x_spec_kwargs = {}
    if nb * nk >= 3:
        x_spec_kwargs["pipeline_mode"] = pl.Buffered(3)

    out = pl.pallas_call(
        kernel,
        out_shape=jax.ShapeDtypeStruct((nb, 1, tile_b), jnp.float32),
        grid=(nb, nk),
        in_specs=[
            pl.BlockSpec((tile_b, tile_f), lambda i, k: (i, k),
                         **x_spec_kwargs),
            pl.BlockSpec((1, tile_f), lambda i, k: (0, k)),
            pl.BlockSpec(memory_space=pltpu.SMEM),
        ],
        out_specs=pl.BlockSpec((1, 1, tile_b), lambda i, k: (i, 0, 0)),
        scratch_shapes=[pltpu.VMEM((1, tile_b), jnp.float32)],
        compiler_params=pltpu.CompilerParams(
            dimension_semantics=("parallel", "arbitrary"),
            vmem_limit_bytes=48 * 1024 * 1024,
        ),
        cost_estimate=pl.CostEstimate(
            flops=2 * B * F,
            transcendentals=B,
            bytes_accessed=(B * F + F + B) * 4,
        ),
    )(x, w, b2d)

    # (nb, 1, tile_b) lane-dense slab -> (B, 1): drop over-read rows, restore
    # the output column.
    return out.reshape(nb * tile_b)[:B].reshape(B, 1)


if __name__ == "__main__":
    batch = 8
    num_features = 32

    key = jax.random.PRNGKey(0)
    kx, kw, kb = jax.random.split(key, 3)

    # Deterministic parameter init (PyTorch nn.Linear-style uniform bound).
    bound = 1.0 / (num_features ** 0.5)
    weight = jax.random.uniform(
        kw, (1, num_features), jnp.float32, minval=-bound, maxval=bound)
    bias = jax.random.uniform(
        kb, (1,), jnp.float32, minval=-bound, maxval=bound)

    x = jax.random.normal(kx, (batch, num_features), jnp.float32)

    out = logistic_regression_forward(x, weight, bias)
    out = jax.block_until_ready(out)

    # Reference check in plain JAX.
    ref = jax.nn.sigmoid(x @ weight.T + bias)
    assert out.shape == (batch, 1)
    assert jnp.allclose(out, ref, atol=1e-5), "mismatch vs reference"

    print("KERNEL_OK")
</pallas_src>

<mosaic_0001>
module attributes {stable_mosaic.version = 11 : i64} {
  func.func @_logreg_kernel(%arg0: i32, %arg1: i32, %arg2: memref<8x32xf32, #tpu.memory_space<vmem>>, %arg3: memref<1x32xf32, #tpu.memory_space<vmem>>, %arg4: memref<1x1xf32, #tpu.memory_space<smem>>, %arg5: memref<1x1x8xf32, #tpu.memory_space<vmem>>, %arg6: memref<1x8xf32, #tpu.memory_space<vmem>>) attributes {dimension_semantics = [#tpu.dimension_semantics<parallel>, #tpu.dimension_semantics<arbitrary>], iteration_bounds = array<i64: 1, 1>, scalar_prefetch = 0 : i64, scratch_operands = 1 : i64, tpu.core_type = #tpu.core_type<tc>, window_params = [{transform_indices = @transform_0, window_bounds = array<i64: 8, 32>}, {transform_indices = @transform_1, window_bounds = array<i64: 1, 32>}, {transform_indices = @transform_2, window_bounds = array<i64: 1, 1>}, {transform_indices = @transform_3, window_bounds = array<i64: 1, 1, 8>}]} {
    %c0_i32 = arith.constant 0 : i32
    %0 = arith.cmpi eq, %arg1, %c0_i32 : i32
    %1 = arith.extui %0 : i1 to i32
    %c0_i32_0 = arith.constant 0 : i32
    %2 = arith.cmpi ne, %1, %c0_i32_0 : i32
    scf.if %2 {
      %cst_10 = arith.constant 0.000000e+00 : f32
      %12 = vector.broadcast %cst_10 : f32 to vector<1x8xf32>
      %c0_11 = arith.constant 0 : index
      %c0_12 = arith.constant 0 : index
      %13 = vector.load %arg6[%c0_11, %c0_12] : memref<1x8xf32, #tpu.memory_space<vmem>>, vector<1x8xf32>
      tpu.vector_store %arg6[%c0_11, %c0_12], %12 {strides = array<i32>} : memref<1x8xf32, #tpu.memory_space<vmem>>, vector<1x8xf32>,
    } else {
    }
    %c0 = arith.constant 0 : index
    %c0_1 = arith.constant 0 : index
    %3 = vector.load %arg2[%c0, %c0_1] : memref<8x32xf32, #tpu.memory_space<vmem>>, vector<8x32xf32>
    %c0_2 = arith.constant 0 : index
    %c0_3 = arith.constant 0 : index
    %4 = vector.load %arg6[%c0_2, %c0_3] : memref<1x8xf32, #tpu.memory_space<vmem>>, vector<1x8xf32>
    %c0_4 = arith.constant 0 : index
    %c0_5 = arith.constant 0 : index
    %5 = vector.load %arg3[%c0_4, %c0_5] : memref<1x32xf32, #tpu.memory_space<vmem>>, vector<1x32xf32>
    %cst = arith.constant dense<0.000000e+00> : vector<1x8xf32>
    %6 = tpu.matmul %5, %3, %cst {dimension_numbers = #tpu.dot_dimension_numbers<[1], [1], [0], [0], [0, 0, 1, 0], [], []>} : vector<1x32xf32>, vector<8x32xf32>, vector<1x8xf32> -> vector<1x8xf32>
    %7 = arith.addf %4, %6 : vector<1x8xf32>
    %c0_6 = arith.constant 0 : index
    %c0_7 = arith.constant 0 : index
    %8 = vector.load %arg6[%c0_6, %c0_7] : memref<1x8xf32, #tpu.memory_space<vmem>>, vector<1x8xf32>
    tpu.vector_store %arg6[%c0_6, %c0_7], %7 {strides = array<i32>} : memref<1x8xf32, #tpu.memory_space<vmem>>, vector<1x8xf32>,
    %c0_i32_8 = arith.constant 0 : i32
    %9 = arith.cmpi eq, %arg1, %c0_i32_8 : i32
    %10 = arith.extui %9 : i1 to i32
    %c0_i32_9 = arith.constant 0 : i32
    %11 = arith.cmpi ne, %10, %c0_i32_9 : i32
    scf.if %11 {
      %c0_10 = arith.constant 0 : index
      %c0_11 = arith.constant 0 : index
      %12 = vector.load %arg6[%c0_10, %c0_11] : memref<1x8xf32, #tpu.memory_space<vmem>>, vector<1x8xf32>
      %c0_12 = arith.constant 0 : index
      %c0_13 = arith.constant 0 : index
      %13 = memref.load %arg4[%c0_12, %c0_13] : memref<1x1xf32, #tpu.memory_space<smem>>
      %14 = vector.broadcast %13 : f32 to vector<1x8xf32>
      %15 = arith.addf %12, %14 : vector<1x8xf32>
      %16 = arith.negf %15 : vector<1x8xf32>
      %17 = math.exp %16 : vector<1x8xf32>
      %cst_14 = arith.constant 1.000000e+00 : f32
      %18 = vector.broadcast %cst_14 : f32 to vector<1x8xf32>
      %19 = arith.addf %18, %17 : vector<1x8xf32>
      %20 = arith.divf %18, %19 : vector<1x8xf32>
      %21 = vector.shape_cast %20 : vector<1x8xf32> to vector<1x1x8xf32>
      %c0_15 = arith.constant 0 : index
      %c0_16 = arith.constant 0 : index
      %c0_17 = arith.constant 0 : index
      %22 = vector.load %arg5[%c0_15, %c0_16, %c0_17] : memref<1x1x8xf32, #tpu.memory_space<vmem>>, vector<1x1x8xf32>
      tpu.vector_store %arg5[%c0_15, %c0_16, %c0_17], %21 {strides = array<i32>} : memref<1x1x8xf32, #tpu.memory_space<vmem>>, vector<1x1x8xf32>,
    } else {
    }
    return
  }
  func.func @transform_0(%arg0: i32, %arg1: i32) -> (i32, i32) {
    %c0_i32 = arith.constant 0 : i32
    return %arg0, %arg1 : i32, i32
  }
  func.func @transform_1(%arg0: i32, %arg1: i32) -> (i32, i32) {
    %c0_i32 = arith.constant 0 : i32
    %c0_i32_0 = arith.constant 0 : i32
    return %c0_i32, %arg1 : i32, i32
  }
  func.func @transform_2(%arg0: i32, %arg1: i32) -> (i32, i32) {
    %c0_i32 = arith.constant 0 : i32
    %c0_i32_0 = arith.constant 0 : i32
    %c0_i32_1 = arith.constant 0 : i32
    return %c0_i32, %c0_i32_0 : i32, i32
  }
  func.func @transform_3(%arg0: i32, %arg1: i32) -> (i32, i32, i32) {
    %c0_i32 = arith.constant 0 : i32
    %c0_i32_0 = arith.constant 0 : i32
    %c0_i32_1 = arith.constant 0 : i32
    return %arg0, %c0_i32, %c0_i32_0 : i32, i32, i32
  }
}

</mosaic_0001>

<bundles_post_ra>
// kernel: tpu_custom_call.1
= control target key start
LH: loop header
LB: loop body
LE: loop exit
PB: predicated region body
PF: predicated region fallthrough
CT: control target
= control target key end

     0   :  { %9 = vsyncpa [#allocation5], 0  ;;  %s213_s0 = inlined_call_operand.hbm [shape: f32[8,32], index: 0, kind: input, shape index: {}]   ;;  %s214_s1 = inlined_call_operand.vmem [shape: f32[1,32], index: 1, kind: input, shape index: {}]   ;;  %s215_s2 = inlined_call_operand.<no memory space> [shape: f32[1,1], index: 2, kind: input, shape index: {}]   ;;  %s216_s3 = inlined_call_operand.hbm [shape: f32[1,1,8], index: 3, kind: output, shape index: {}]  }
   0x1   :  { %10 = vsyncpa [#allocation6], 0  ;;  %s16_s14 = sshll.u32 %s213_s0, 4  ;;  %s175_s15 = smov [#allocation4]   ;;  %s17_s14 = int_to_ptr.hbm [resolvable:$true] %s16_s14 }
   0x2   :  { %s18_s16 = sshll.u32 %s175_s15, 4  ;;  %s19_s16 = int_to_ptr.vmem [resolvable:$true] %s18_s16 }
   0x3   :  { %21 = dma.hbm_to_vmem [thread:$0]  %s17_s14, 128, %s19_s16, [#allocation5]  }
   0x4   :  { %171 = dma.done.wait [#allocation5], 128  }
   0x5   :  { %172 = vsyncadd [#allocation5], 4294967168  ;;  %vm34_vm0 = vcmask 57344   ;;  %v176_v0 = vmov 0.0   ;;  %vm39_vm1 = vcmask 261120   ;;  %v36_v1 = vld [vmem:[#allocation4] sm:$0xff]  ;;  %v74_v6 = vstv %s215_s2 }
   0x6   :  { %35 = vst.msk [vmem:[#allocation2] sm:$0x1] %vm34_vm0, %v176_v0  ;;  %113 = vmatpush.xpose.msk.msra.mxu0 %vm39_vm1, %v36_v1  ;;  %v38_v2 = vld [vmem:[%s214_s1] sm:$0x1]  ;;  %s177_s1 = smov [#allocation7]   ;;  %s103_s2 = sshll.u32 %s216_s3, 4  ;;  %s104_s2 = int_to_ptr.hbm [resolvable:$true] %s103_s2 }
   0x7   :  { %s101_s20 = sshll.u32 %s177_s1, 4  ;;  %s102_s20 = int_to_ptr.vmem [resolvable:$true] %s101_s20 }
   0x9   :  { %114 = vmatmul.msk.f32.vlgmr.msra.gmra.mxu0 %vm39_vm1, %v38_v2 }
   0xd   :  { %v37_v3 = vld [vmem:[#allocation2] sm:$0x1] }
  0x86   :  { %v63_v4 = vpop.f32.mrf.mxu0 }
  0x87   :  { %v66_v5 = vadd.f32 %v63_v4, %v37_v3 }
  0x89   :  { %68 = vst.msk [vmem:[#allocation2] sm:$0x1] %vm34_vm0, %v66_v5 }
  0x90   :  { %v72_v7 = vld [vmem:[#allocation2] sm:$0x1] }
  0x91   :  { %v75_v8 = vadd.f32 %v74_v6, %v72_v7 }
  0x93   :  { %v115_v9 = vmul.f32 -1.442695, %v75_v8 }
  0x95   :  { %119 = vpow2.f32 %v115_v9 }
  0x9b   :  { %v120_v10 = vpop.eup %119 }
  0x9c   :  { %v79_v11 = vadd.f32 1.0, %v120_v10 }
  0x9e   :  { %121 = vrcp.f32 %v79_v11  ;;  %v91_v15 = vand.u32 2147483648, %v79_v11  ;;  %v89_v17 = vand.u32 2147483647, %v79_v11  ;;  %vm85_vm3 = vweird.f32 %v79_v11 }
  0xa0   :  { %v92_v19 = vor.u32 1.1754944e-38, %v91_v15  ;;  %vm90_vm5 = vcmp.eq.f32.partialorder %v89_v17, 8.507059e+37 }
  0xa4   :  { %v122_v12 = vpop.eup %121 }
  0xa5   :  { %v81_v13 = vmul.f32 %v122_v12, %v79_v11  ;;  %vm86_vm2 = vweird.f32 %v122_v12 }
  0xa6   :  { %vm87_vm4 = vmor %vm85_vm3, %vm86_vm2 }
  0xa7   :  { %v82_v14 = vsub.f32 1.0, %v81_v13 }
  0xa9   :  { %v83_v16 = vmul.f32 %v122_v12, %v82_v14 }
  0xab   :  { %v84_v18 = vadd.f32 %v122_v12, %v83_v16 }
  0xad   :  { %v88_v20 = vsel %vm87_vm4, %v122_v12, %v84_v18 }
  0xae   :  { %v93_v21 = vsel %vm90_vm5, %v92_v19, %v88_v20 }
  0xaf   :  { %95 = vst.msk [vmem:[#allocation7] sm:$0x1] %vm34_vm0, %v93_v21 }
  0xb0   :  { %106 = dma.vmem_to_hbm [thread:$0]  %s102_s20, 16, %s104_s2, [#allocation6]  }
  0xb1   :  { %173 = dma.done.wait [#allocation6], 16  }
  0xb2   :  { %174 = vsyncadd [#allocation6], 4294967280 }
  0xb3   :  { %111 = vsyncpa [#allocation5], 1 }
  0xb4   :  { %112 = vsyncpa [#allocation6], 1 }

</bundles_post_ra>
